<compile_context>
chip_gen: v7x
topology: tpu7x:2x2x1
jax: 0.10.0
libtpu: 0.0.40
codegen_flags: <defaults>
</compile_context>

<pallas_src>
import functools

import numpy as np
import jax
import jax.numpy as jnp
from jax import lax
from jax.experimental import pallas as pl
from jax.experimental.pallas import tpu as pltpu

_SQRT_HALF = 0.7071067811865476


def _round_up(x, m):
    return ((x + m - 1) // m) * m


def _softplus(x):
    return jnp.maximum(x, 0.0) + jnp.log1p(jnp.exp(-jnp.abs(x)))


# --------------------------------------------------------------------------- #
# Kernel 1: STFT mask (softplus/exp) + complex-magnitude masking               #
#   grid = (2, B): c = mid/side channel (outer, so the noise block stays       #
#   VMEM-resident across the whole batch), b = batch (inner).                  #
# --------------------------------------------------------------------------- #
def _mask_mul_kernel(init_ref, delta_ref, nre_ref, nim_ref, ore_ref, oim_ref):
    """init/delta: (1,1,1,K); noise re/im: (1,M,K); out re/im: (1,1,M,K)."""
    M = nre_ref.shape[1]
    # per-bin quantities on the small (1, K) vectors
    init8 = init_ref[0, 0] * 0.125                               # H0 / 8
    sp8 = _softplus(delta_ref[0, 0]) * 0.125                     # softplus(dH) / 8
    m_idx = lax.broadcasted_iota(jnp.int32, (M, 1), 0).astype(jnp.float32)
    # mask[m, k] = exp((H0[k] - m * softplus(dH[k])) / 8)
    # NOTE: the exp stays per-element on the (M, K) block; this kernel is DMA-bound and the
    # EUP slot otherwise idles, so offloading powers to the VPU would not change wall time.
    mask = jnp.exp(init8 - sp8 * m_idx)                          # (M, K)
    # TODO(synk): gain_envelope=True path (adds G[m]) not implemented; module default is False.
    ore_ref[0, 0] = nre_ref[0] * mask
    oim_ref[0, 0] = nim_ref[0] * mask


# --------------------------------------------------------------------------- #
# Kernel 2: pseudo mid/side -> LR, impulse normalization, causal FIR conv      #
#   grid = (num_time_tiles,), "parallel".  Input halo is DMA'd manually so     #
#   VMEM stays bounded by (2B, TL + ir_len - 1) regardless of L.               #
# --------------------------------------------------------------------------- #
def _conv_kernel(fir_ref, u_hbm, y_ref, u_buf, g_sc, sem, *, tap_block):
    """fir_ref: (2, B, irl) VMEM, time-reversed mid/side IR (resident across tiles);
    u_hbm: (2B, irl-1+Lp) HBM, channel-major folded, left zero-padded;
    y_ref: (2B, TL) output tile; u_buf: (2B, TL+irl-1) halo scratch;
    g_sc: (2B, irl) scratch holding the normalized, time-reversed LR FIR."""
    rows, TL = y_ref.shape
    B = fir_ref.shape[1]
    irl = fir_ref.shape[2]
    t = pl.program_id(0)

    # start the halo DMA for this output tile
    start = pl.multiple_of(t * TL, TL)
    cp = pltpu.make_async_copy(u_hbm.at[:, pl.ds(start, TL + irl - 1)], u_buf, sem)
    cp.start()

    # while the DMA is in flight: pseudo mid/side -> LR (registers) + normalize_impulse (rsqrt)
    mid = fir_ref[0]                                             # (B, irl)
    side = fir_ref[1]                                            # (B, irl)
    left = (mid + side) * _SQRT_HALF
    right = (mid - side) * _SQRT_HALF
    energy = 0.5 * (jnp.sum(left * left, axis=-1, keepdims=True)
                    + jnp.sum(right * right, axis=-1, keepdims=True))  # (B, 1)
    scale = lax.rsqrt(energy + 1e-12)
    g_sc[0:B, :] = left * scale                                  # rows [0:B]   = left FIR
    g_sc[B:2 * B, :] = right * scale                             # rows [B:2B]  = right FIR

    cp.wait()

    # causal FIR: y[n] = sum_i g[i] * u_buf[n + i]  (g is the time-reversed FIR)
    # taps are loaded in blocks of `tap_block`, the inner loop is statically unrolled and
    # accumulates into two independent chains to break the add-latency dependency.
    zeros = jnp.zeros((rows, TL), jnp.float32)

    def body(q, carry):
        a0, a1 = carry
        i0 = pl.multiple_of(q * tap_block, tap_block)
        taps = g_sc[:, pl.ds(i0, tap_block)]                     # (2B, tap_block), one load / block
        for p in range(tap_block):                               # static unroll
            seg = u_buf[:, pl.ds(i0 + p, TL)]                    # (2B, TL)
            tap = taps[:, p:p + 1]                               # (2B, 1)
            if p % 2 == 0:
                a0 = a0 + tap * seg
            else:
                a1 = a1 + tap * seg
        return a0, a1

    # TODO(synk): per-channel FIR is a matrix-vector product, so an MXU Toeplitz formulation would
    # only use 1/256 of the MXU columns; the conv therefore stays on the VPU.
    a0, a1 = lax.fori_loop(0, irl // tap_block, body, (zeros, zeros))
    y_ref[...] = a0 + a1


# --------------------------------------------------------------------------- #
# JAX glue: window, fixed-noise STFT, inverse STFT                             #
# --------------------------------------------------------------------------- #
def _hann_window(n_fft):
    n = jnp.arange(n_fft, dtype=jnp.float32)
    return 0.5 - 0.5 * jnp.cos(2.0 * jnp.pi * n / n_fft)   # torch.hann_window (periodic)


def _fixed_noise_stft(ir_len, n_fft, hop_length, window):
    # matches get_fixed_noise(): np.random.RandomState(0), uniform [-1, 1)
    rng = np.random.RandomState(0)
    noise = rng.uniform(size=(2, ir_len)) * 2.0 - 1.0
    noise = jnp.asarray(noise, jnp.float32)
    pad = n_fft // 2
    noise_pad = jnp.pad(noise, ((0, 0), (pad, pad)), mode="reflect")   # center=True, reflect
    num_frames = 1 + ir_len // hop_length
    idx = jnp.arange(num_frames)[:, None] * hop_length + jnp.arange(n_fft)[None, :]
    frames = noise_pad[:, idx] * window[None, None, :]                 # (2, M, n_fft)
    return jnp.fft.rfft(frames, axis=-1)                               # (2, M, K)


def _istft(stft, n_fft, hop_length, window, length):
    # stft: (N, M, K) complex -> (N, length) real, matching torch.istft(center=True)
    N, M, _ = stft.shape
    frames = jnp.fft.irfft(stft, n=n_fft, axis=-1) * window[None, None, :]   # (N, M, n_fft)
    total = n_fft + hop_length * (M - 1)
    idx = (jnp.arange(M)[:, None] * hop_length + jnp.arange(n_fft)[None, :]).reshape(-1)
    y = jnp.zeros((N, total), jnp.float32).at[:, idx].add(frames.reshape(N, -1))
    wsq = jnp.broadcast_to(window * window, (M, n_fft)).reshape(-1)
    env = jnp.zeros((total,), jnp.float32).at[idx].add(wsq)
    y = y / jnp.where(env > 1e-11, env, 1.0)[None, :]
    pad = n_fft // 2
    return y[:, pad:pad + length]


# --------------------------------------------------------------------------- #
# Forward pass                                                                 #
# --------------------------------------------------------------------------- #
def stft_masked_noise_reverb(input_signals, init_log_magnitude, delta_log_magnitude,
                             *, ir_len, n_fft, hop_length, time_tile=512, tap_block=8):
    B, C, L = input_signals.shape
    assert C == 2
    K = 1 + n_fft // 2
    M = 1 + ir_len // hop_length
    assert ir_len % tap_block == 0, "ir_len must be a multiple of tap_block"

    window = _hann_window(n_fft)
    noise_stft = _fixed_noise_stft(ir_len, n_fft, hop_length, window)  # (2, M, K) complex64
    noise_re = jnp.real(noise_stft).astype(jnp.float32)                # passed ONCE, no B broadcast
    noise_im = jnp.imag(noise_stft).astype(jnp.float32)

    # channel(mid/side)-major parameters: (2, B, 1, K)
    init_cb = jnp.transpose(init_log_magnitude.astype(jnp.float32), (1, 0, 2)).reshape(2, B, 1, K)
    delta_cb = jnp.transpose(delta_log_magnitude.astype(jnp.float32), (1, 0, 2)).reshape(2, B, 1, K)

    # ---- kernel 1: masked noise STFT ----
    out_sd = jax.ShapeDtypeStruct((2, B, M, K), jnp.float32)
    ir_re, ir_im = pl.pallas_call(
        _mask_mul_kernel,
        grid=(2, B),
        in_specs=[pl.BlockSpec((1, 1, 1, K), lambda c, b: (c, b, 0, 0)),
                  pl.BlockSpec((1, 1, 1, K), lambda c, b: (c, b, 0, 0)),
                  pl.BlockSpec((1, M, K), lambda c, b: (c, 0, 0)),
                  pl.BlockSpec((1, M, K), lambda c, b: (c, 0, 0))],
        out_specs=(pl.BlockSpec((1, 1, M, K), lambda c, b: (c, b, 0, 0)),
                   pl.BlockSpec((1, 1, M, K), lambda c, b: (c, b, 0, 0))),
        out_shape=(out_sd, out_sd),
        compiler_params=pltpu.CompilerParams(
            dimension_semantics=("parallel", "parallel")),
    )(init_cb, delta_cb, noise_re, noise_im)

    # ---- inverse STFT (glue: no Pallas FFT primitive) ----
    ir_stft = lax.complex(ir_re.reshape(2 * B, M, K), ir_im.reshape(2 * B, M, K))
    ir = _istft(ir_stft, n_fft, hop_length, window, ir_len)            # (2B, ir_len): mid rows, side rows
    fir_ms = jnp.flip(ir.reshape(2, B, ir_len), axis=-1)               # time-reversed for the conv loop

    # ---- kernel 2: ms->lr, normalize, causal channel-wise convolution ----
    # channel-major folded audio: rows [0:B] = left, rows [B:2B] = right
    u_cb = jnp.transpose(input_signals.astype(jnp.float32), (1, 0, 2)).reshape(2 * B, L)

    TL = max(128, (int(time_tile) // 128) * 128)
    Lp = _round_up(L, TL)
    num_tiles = Lp // TL
    u_pad = jnp.pad(u_cb, ((0, 0), (ir_len - 1, Lp - L)))              # causal left pad + tile pad

    vmem_bytes = 4 * (2 * B * (TL + ir_len - 1)        # halo scratch
                      + 3 * 2 * B * ir_len             # fir (double-buffered) + g scratch
                      + 2 * 2 * B * TL)                # double-buffered output tile
    vmem_limit = int(min(110 * 2 ** 20, max(32 * 2 ** 20, 2 * vmem_bytes)))

    y = pl.pallas_call(
        functools.partial(_conv_kernel, tap_block=tap_block),
        grid=(num_tiles,),
        in_specs=[pl.BlockSpec((2, B, ir_len), lambda t: (0, 0, 0)),   # FIR resident across tiles
                  pl.BlockSpec(memory_space=pl.ANY)],                  # padded input stays in HBM
        out_specs=pl.BlockSpec((2 * B, TL), lambda t: (0, t)),
        out_shape=jax.ShapeDtypeStruct((2 * B, Lp), jnp.float32),
        scratch_shapes=[pltpu.VMEM((2 * B, TL + ir_len - 1), jnp.float32),
                        pltpu.VMEM((2 * B, ir_len), jnp.float32),
                        pltpu.SemaphoreType.DMA(())],
        compiler_params=pltpu.CompilerParams(
            dimension_semantics=("parallel",),
            vmem_limit_bytes=vmem_limit),
    )(fir_ms, u_pad)

    y = y.reshape(2, B, Lp)[:, :, :L]
    return jnp.transpose(y, (1, 0, 2))                                 # (B, 2, L)


if __name__ == "__main__":
    # Small, forward-consistent shapes: B=2, stereo, L=512, ir_len=256, n_fft=64, hop=32
    B, L = 2, 512
    ir_len, n_fft, hop_length = 256, 64, 32
    K = 1 + n_fft // 2  # 33

    key = jax.random.PRNGKey(0)
    k1, k2, k3 = jax.random.split(key, 3)
    input_signals = jax.random.normal(k1, (B, 2, L), jnp.float32)
    init_log_magnitude = 0.5 * jax.random.normal(k2, (B, 2, K), jnp.float32)
    delta_log_magnitude = 0.5 * jax.random.normal(k3, (B, 2, K), jnp.float32)

    out = stft_masked_noise_reverb(
        input_signals, init_log_magnitude, delta_log_magnitude,
        ir_len=ir_len, n_fft=n_fft, hop_length=hop_length,
        time_tile=128,  # small tile so the demo exercises the time grid (4 tiles)
    )
    jax.block_until_ready(out)
    assert out.shape == (B, 2, L) and out.dtype == jnp.float32
    print("KERNEL_OK")
</pallas_src>

<mosaic_0001>
module attributes {stable_mosaic.version = 11 : i64} {
  func.func @_mask_mul_kernel(%arg0: i32, %arg1: i32, %arg2: memref<1x1x1x33xf32, #tpu.memory_space<vmem>>, %arg3: memref<1x1x1x33xf32, #tpu.memory_space<vmem>>, %arg4: memref<1x9x33xf32, #tpu.memory_space<vmem>>, %arg5: memref<1x9x33xf32, #tpu.memory_space<vmem>>, %arg6: memref<1x1x9x33xf32, #tpu.memory_space<vmem>>, %arg7: memref<1x1x9x33xf32, #tpu.memory_space<vmem>>) attributes {dimension_semantics = [#tpu.dimension_semantics<parallel>, #tpu.dimension_semantics<parallel>], iteration_bounds = array<i64: 2, 2>, scalar_prefetch = 0 : i64, scratch_operands = 0 : i64, tpu.core_type = #tpu.core_type<tc>, window_params = [{transform_indices = @transform_0, window_bounds = array<i64: 1, 1, 1, 33>}, {transform_indices = @transform_1, window_bounds = array<i64: 1, 1, 1, 33>}, {transform_indices = @transform_2, window_bounds = array<i64: 1, 9, 33>}, {transform_indices = @transform_3, window_bounds = array<i64: 1, 9, 33>}, {transform_indices = @transform_4, window_bounds = array<i64: 1, 1, 9, 33>}, {transform_indices = @transform_5, window_bounds = array<i64: 1, 1, 9, 33>}]} {
    %c0 = arith.constant 0 : index
    %c0_0 = arith.constant 0 : index
    %c0_1 = arith.constant 0 : index
    %c0_2 = arith.constant 0 : index
    %0 = vector.load %arg2[%c0, %c0_0, %c0_1, %c0_2] : memref<1x1x1x33xf32, #tpu.memory_space<vmem>>, vector<1x1x1x33xf32>
    %1 = vector.shape_cast %0 : vector<1x1x1x33xf32> to vector<1x33xf32>
    %cst = arith.constant 1.250000e-01 : f32
    %2 = vector.broadcast %cst : f32 to vector<1x33xf32>
    %3 = arith.mulf %1, %2 : vector<1x33xf32>
    %c0_3 = arith.constant 0 : index
    %c0_4 = arith.constant 0 : index
    %c0_5 = arith.constant 0 : index
    %c0_6 = arith.constant 0 : index
    %4 = vector.load %arg3[%c0_3, %c0_4, %c0_5, %c0_6] : memref<1x1x1x33xf32, #tpu.memory_space<vmem>>, vector<1x1x1x33xf32>
    %5 = vector.shape_cast %4 : vector<1x1x1x33xf32> to vector<1x33xf32>
    %cst_7 = arith.constant 0.000000e+00 : f32
    %6 = vector.broadcast %cst_7 : f32 to vector<1x33xf32>
    %7 = arith.maximumf %5, %6 : vector<1x33xf32>
    %8 = math.absf %5 : vector<1x33xf32>
    %cst_8 = arith.constant 0.000000e+00 : f32
    %9 = vector.broadcast %cst_8 : f32 to vector<1x33xf32>
    %10 = arith.subf %9, %8 : vector<1x33xf32>
    %11 = math.exp %10 : vector<1x33xf32>
    %12 = math.log1p %11 : vector<1x33xf32>
    %13 = arith.addf %7, %12 : vector<1x33xf32>
    %cst_9 = arith.constant 1.250000e-01 : f32
    %14 = vector.broadcast %cst_9 : f32 to vector<1x33xf32>
    %15 = arith.mulf %13, %14 : vector<1x33xf32>
    %16 = tpu.iota {dimensions = array<i32: 0>} : vector<9x1xi32>
    %17 = arith.sitofp %16 : vector<9x1xi32> to vector<9x1xf32>
    %18 = vector.broadcast %15 : vector<1x33xf32> to vector<9x33xf32>
    %19 = vector.broadcast %17 : vector<9x1xf32> to vector<9x33xf32>
    %20 = arith.mulf %18, %19 : vector<9x33xf32>
    %21 = vector.broadcast %3 : vector<1x33xf32> to vector<9x33xf32>
    %22 = arith.subf %21, %20 : vector<9x33xf32>
    %23 = math.exp %22 : vector<9x33xf32>
    %c0_10 = arith.constant 0 : index
    %c0_11 = arith.constant 0 : index
    %c0_12 = arith.constant 0 : index
    %24 = vector.load %arg4[%c0_10, %c0_11, %c0_12] : memref<1x9x33xf32, #tpu.memory_space<vmem>>, vector<1x9x33xf32>
    %25 = vector.shape_cast %24 : vector<1x9x33xf32> to vector<9x33xf32>
    %26 = arith.mulf %25, %23 : vector<9x33xf32>
    %c0_13 = arith.constant 0 : index
    %c0_14 = arith.constant 0 : index
    %c0_15 = arith.constant 0 : index
    %c0_16 = arith.constant 0 : index
    %27 = vector.load %arg6[%c0_13, %c0_14, %c0_15, %c0_16] : memref<1x1x9x33xf32, #tpu.memory_space<vmem>>, vector<1x1x9x33xf32>
    %28 = vector.shape_cast %27 : vector<1x1x9x33xf32> to vector<9x33xf32>
    %29 = vector.shape_cast %26 : vector<9x33xf32> to vector<1x1x9x33xf32>
    tpu.vector_store %arg6[%c0_13, %c0_14, %c0_15, %c0_16], %29 {strides = array<i32>} : memref<1x1x9x33xf32, #tpu.memory_space<vmem>>, vector<1x1x9x33xf32>,
    %c0_17 = arith.constant 0 : index
    %c0_18 = arith.constant 0 : index
    %c0_19 = arith.constant 0 : index
    %30 = vector.load %arg5[%c0_17, %c0_18, %c0_19] : memref<1x9x33xf32, #tpu.memory_space<vmem>>, vector<1x9x33xf32>
    %31 = vector.shape_cast %30 : vector<1x9x33xf32> to vector<9x33xf32>
    %32 = arith.mulf %31, %23 : vector<9x33xf32>
    %c0_20 = arith.constant 0 : index
    %c0_21 = arith.constant 0 : index
    %c0_22 = arith.constant 0 : index
    %c0_23 = arith.constant 0 : index
    %33 = vector.load %arg7[%c0_20, %c0_21, %c0_22, %c0_23] : memref<1x1x9x33xf32, #tpu.memory_space<vmem>>, vector<1x1x9x33xf32>
    %34 = vector.shape_cast %33 : vector<1x1x9x33xf32> to vector<9x33xf32>
    %35 = vector.shape_cast %32 : vector<9x33xf32> to vector<1x1x9x33xf32>
    tpu.vector_store %arg7[%c0_20, %c0_21, %c0_22, %c0_23], %35 {strides = array<i32>} : memref<1x1x9x33xf32, #tpu.memory_space<vmem>>, vector<1x1x9x33xf32>,
    return
  }
  func.func @transform_0(%arg0: i32, %arg1: i32) -> (i32, i32, i32, i32) {
    %c0_i32 = arith.constant 0 : i32
    %c0_i32_0 = arith.constant 0 : i32
    %c0_i32_1 = arith.constant 0 : i32
    return %arg0, %arg1, %c0_i32, %c0_i32_0 : i32, i32, i32, i32
  }
  func.func @transform_1(%arg0: i32, %arg1: i32) -> (i32, i32, i32, i32) {
    %c0_i32 = arith.constant 0 : i32
    %c0_i32_0 = arith.constant 0 : i32
    %c0_i32_1 = arith.constant 0 : i32
    return %arg0, %arg1, %c0_i32, %c0_i32_0 : i32, i32, i32, i32
  }
  func.func @transform_2(%arg0: i32, %arg1: i32) -> (i32, i32, i32) {
    %c0_i32 = arith.constant 0 : i32
    %c0_i32_0 = arith.constant 0 : i32
    %c0_i32_1 = arith.constant 0 : i32
    return %arg0, %c0_i32, %c0_i32_0 : i32, i32, i32
  }
  func.func @transform_3(%arg0: i32, %arg1: i32) -> (i32, i32, i32) {
    %c0_i32 = arith.constant 0 : i32
    %c0_i32_0 = arith.constant 0 : i32
    %c0_i32_1 = arith.constant 0 : i32
    return %arg0, %c0_i32, %c0_i32_0 : i32, i32, i32
  }
  func.func @transform_4(%arg0: i32, %arg1: i32) -> (i32, i32, i32, i32) {
    %c0_i32 = arith.constant 0 : i32
    %c0_i32_0 = arith.constant 0 : i32
    %c0_i32_1 = arith.constant 0 : i32
    return %arg0, %arg1, %c0_i32, %c0_i32_0 : i32, i32, i32, i32
  }
  func.func @transform_5(%arg0: i32, %arg1: i32) -> (i32, i32, i32, i32) {
    %c0_i32 = arith.constant 0 : i32
    %c0_i32_0 = arith.constant 0 : i32
    %c0_i32_1 = arith.constant 0 : i32
    return %arg0, %arg1, %c0_i32, %c0_i32_0 : i32, i32, i32, i32
  }
}

</mosaic_0001>

<bundles_post_ra>
// kernel: tpu_custom_call.1
= control target key start
LH: loop header
LB: loop body
LE: loop exit
PB: predicated region body
PF: predicated region fallthrough
CT: control target
= control target key end

     0   :  { %s724_s18 = smov 0   ;;  %s726_s19 = smov 0   ;;  %s796_s0 = inlined_call_operand.vmem [shape: f32[2,2,1,33], index: 0, kind: input, shape index: {}]   ;;  %s797_s1 = inlined_call_operand.vmem [shape: f32[2,2,1,33], index: 1, kind: input, shape index: {}]   ;;  %s798_s2 = inlined_call_operand.vmem [shape: f32[2,9,33], index: 2, kind: input, shape index: {}]   ;;  %s799_s3 = inlined_call_operand.vmem [shape: f32[2,9,33], index: 3, kind: input, shape index: {}]   ;;  %s800_s4 = inlined_call_operand.vmem [shape: f32[2,2,9,33], index: 4, kind: output, shape index: {0}]   ;;  %s801_s5 = inlined_call_operand.vmem [shape: f32[2,2,9,33], index: 5, kind: output, shape index: {1}]  }
   0x1   :  { %s728_s20 = smov 0   ;;  %s730_s21 = smov 0  }
   0x2   :  { %s732_s22 = smov 0  }
   0x3 LB: > { %s25_s23 = sadd.s32 1, %s684_s20  ;;  %s28_s24 = sadd.s32 1, %s688_s21  ;;  %s692_s22 = sphi %s732_s22, %s16_s22   ;;  %s688_s21 = sphi %s730_s21, %s805_s21   ;;  %s684_s20 = sphi %s728_s20, %s804_s20   ;;  %s680_s19 = sphi %s726_s19, %s803_s19   ;;  %s676_s18 = sphi %s724_s18, %s802_s18  }
   0x4   : > { %p26_p0 = scmp.ge.s32.totalorder %s25_s23, 2  ;;  %p589_p1 = scmp.ge.s32.totalorder %s692_s22, 1 }
   0x5   : > { %p244_p2 = scmp.lt.s32.totalorder %s692_s22, 5 }
   0x6   : > { %s807_s23 = smov (%p26_p0, %s25_s23), 0  ;;  %s809_s24 = smov (!%p26_p0, %s28_s24), %s688_s21 }
   0x7   : > { %p245_p3 = pnand %p589_p1, %p244_p2  ;;  %p30_p4 = scmp.ge.s32.totalorder %s809_s24, 2 }
   0x8   : > { %p304_p5 = scmp.lt.s32.totalorder (!%p245_p3), %s680_s19, 1  ;;  %p306_p6 = scmp.lt.s32.totalorder (!%p245_p3), %s676_s18, 1  ;;  %v365_v7 = vlaneseq (!%p245_p3)  ;;  %vm394_vm1 = vcmask (!%p245_p3), 269312   ;;  %vm396_vm2 = vcmask (!%p245_p3), 262144  }
   0x9   : > { %s811_s24 = smov (%p30_p4, %s809_s24), 0  ;;  %248 = sbr.rel (%p245_p3) target bundleno = 81 (0x51), region = 36 }
   0xa   : > { %v366_v10 = vshrl.u32 (!%p245_p3), %v365_v7, 7 }
   0xc   : > { %v367_v16 = vadd.s32 (!%p245_p3), 8, %v366_v10  ;;  %v373_v20 = vsub.s32 (!%p245_p3), 0, %v366_v10  ;;  %v368_v22 = vcvt.s32.f32 (!%p245_p3), %v366_v10 }
   0xe   : > { %v369_v23 = vcvt.s32.f32 (!%p245_p3), %v367_v16 }
  0x10   : > { %s813_s19 = smov (!%p304_p5, %s680_s19), 1  ;;  %s815_s18 = smov (!%p306_p6, %s676_s18), 1 }
  0x11   : > { %s590_s25 = sshll.u32 %s813_s19, 1  ;;  %s596_s8 = sshll.u32 %s815_s18, 1 }
  0x12   : > { %s309_s26 = sadd.s32 %s590_s25, %s815_s18  ;;  %s597_s9 = sshll.u32 %s813_s19, 2 }
  0x13   : > { %s317_s29 = scalar_lea.vmem %s797_s1, %s309_s26  ;;  %s310_s7 = scalar_lea.vmem %s796_s0, %s309_s26 }
  0x14   : > { %v348_v0 = vld [vmem:[%s317_s29] sm:$0x1]  ;;  %s604_s10 = sshll.u32 %s813_s19, 4  ;;  %s334_s11 = sadd.s32 %s597_s9, %s596_s8 }
  0x15   : > { %v350_v1 = vand.u32 2147483647, %v348_v0  ;;  %v349_v13 = vmax.f32 %v348_v0, 0.0  ;;  %v346_v14 = vld [vmem:[%s310_s7] sm:$0x1]  ;;  %s322_s14 = scalar_lea.vmem %s798_s2, %s604_s10  ;;  %s327_s17 = scalar_lea.vmem %s799_s3, %s604_s10 }
  0x16   : > { %v347_v18 = vmul.f32 0.125, %v346_v14  ;;  %s598_s25 = sshll.u32 %s334_s11, 3  ;;  %v390_v32 = vld [vmem:[%s322_s14] sm:$0xff]  ;;  %v391_v34 = vld [vmem:[%s322_s14 + $0x8] sm:$0x1] }
  0x17   : > { %v351_v2 = vsub.f32 0.0, %v350_v1  ;;  %v398_v33 = vld [vmem:[%s327_s17] sm:$0xff]  ;;  %v399_v35 = vld [vmem:[%s327_s17 + $0x8] sm:$0x1]  ;;  %s336_s27 = scalar_lea.vmem %s800_s4, %s598_s25  ;;  %s345_s29 = scalar_lea.vmem %s801_s5, %s598_s25 }
  0x18   : > { %v382_v25 = vrot.slane %v347_v18, %v373_v20 }
  0x19   : > { %v352_v3 = vmul.f32 1.442695, %v351_v2 }
  0x1b   : > { %646 = vpow2.f32 %v352_v3 }
  0x25   : > { %v647_v4 = vpop.eup %646 }
  0x26   : > { %v354_v5 = vadd.f32 1.0, %v647_v4  ;;  %v357_v6 = vmul.f32 -0.5, %v647_v4  ;;  %v360_v9 = vand.u32 2147483647, %v647_v4 }
  0x28   : > { %648 = vlog2.f32 %v354_v5  ;;  %v358_v8 = vadd.f32 1.0, %v357_v6  ;;  %vm361_vm0 = vcmp.lt.f32.partialorder %v360_v9, 0.0004427343 }
  0x2a   : > { %v359_v11 = vmul.f32 %v647_v4, %v358_v8 }
  0x32   : > { %v649_v12 = vpop.eup %648 }
  0x33   : > { %v356_v15 = vmul.f32 0.6931472, %v649_v12 }
  0x35   : > { %v362_v17 = vsel %vm361_vm0, %v359_v11, %v356_v15 }
  0x36   : > { %v363_v19 = vadd.f32 %v362_v17, %v349_v13 }
  0x38   : > { %v364_v21 = vmul.f32 0.125, %v363_v19 }
  0x3a   : > { %v374_v24 = vrot.slane %v364_v21, %v373_v20 }
  0x3c   : > { %v376_v26 = vmul.f32 %v374_v24, %v368_v22  ;;  %v377_v27 = vmul.f32 %v374_v24, %v369_v23 }
  0x3e   : > { %v384_v28 = vsub.f32 %v382_v25, %v376_v26  ;;  %v385_v29 = vsub.f32 %v382_v25, %v377_v27 }
  0x40   : > { %v386_v30 = vmul.f32 1.442695, %v384_v28  ;;  %v388_v31 = vmul.f32 1.442695, %v385_v29 }
  0x42   : > { %650 = vpow2.f32 %v386_v30 }
  0x43   : > { %652 = vpow2.f32 %v388_v31 }
  0x4c   : > { %v651_v36 = vpop.eup %650 }
  0x4d   : > { %v653_v37 = vpop.eup %652  ;;  %v392_v38 = vmul.f32 %v651_v36, %v390_v32  ;;  %v400_v39 = vmul.f32 %v651_v36, %v398_v33 }
  0x4e   : > { %v393_v40 = vmul.f32 %v653_v37, %v391_v34  ;;  %v401_v41 = vmul.f32 %v653_v37, %v399_v35 }
  0x4f   : > { %395 = vst.msk [vmem:[%s336_s27] sm:$0xff] %vm394_vm1, %v392_v38  ;;  %402 = vst.msk [vmem:[%s345_s29] sm:$0xff] %vm394_vm1, %v400_v39 }
  0x50   : > { %397 = vst.msk [vmem:[%s336_s27 + $0x8] sm:$0x1] %vm396_vm2, %v393_v40  ;;  %403 = vst.msk [vmem:[%s345_s29 + $0x8] sm:$0x1] %vm396_vm2, %v401_v41 }
  0x51 PF: > { %s16_s22 = sadd.s32 1, %s692_s22   ;;  %s802_s18 = smov %s684_s20 }
  0x52   : > { %p13_p7 = scmp.ge.s32.totalorder %s16_s22, 6   ;;  %s803_s19 = smov %s688_s21 }
  0x53   : > { %s804_s20 = smov %s807_s23  ;;  %s805_s21 = smov %s811_s24 }
  0x54   :  { %15 = sbr.rel (!%p13_p7) target bundleno = 3 (0x3), region = 87 }

</bundles_post_ra>
